<compile_context>
chip_gen: v6e
topology: v6e:2x2x1
jax: 0.10.0
libtpu: 0.0.40
codegen_flags: <defaults>
</compile_context>

<pallas_src>
import jax
import jax.numpy as jnp
from jax.experimental import pallas as pl
from jax.experimental.pallas import tpu as pltpu

# ---------------- module hyper-parameters (small, synthetic) ----------------
DIM = 32                      # model dim (C)
EXPANSION = 2
INNER = DIM * EXPANSION       # 64
KERNEL_SIZE = 7
PAD_L = KERNEL_SIZE // 2                          # calc_same_padding
PAD_R = PAD_L - (KERNEL_SIZE + 1) % 2
T = 16                        # sequence length
B = 2                         # batch
ROWS = T * B                  # flattened (T, B) token rows (row r = t*B + b)
LN_EPS = 1e-5
BN_EPS = 1e-5

# Row layout of the packed per-channel vector array `wvec` (shape (K+4, INNER)):
#   rows 0..K-1 : depthwise taps (eval-BN scale folded in)
#   row  K      : depthwise bias (eval-BN mean/shift folded in)
#   row  K+1    : pointwise-conv-1 bias, value half (LN beta folded in)
#   row  K+2    : pointwise-conv-1 bias, gate half  (LN beta folded in)
#   row  K+3    : pointwise-conv-2 bias (lanes 0:DIM valid, rest zero)
ROW_DWB = KERNEL_SIZE
ROW_B1V = KERNEL_SIZE + 1
ROW_B1G = KERNEL_SIZE + 2
ROW_B2 = KERNEL_SIZE + 3


def conformer_conv_kernel(x_ref, wmat_ref, wvec_ref, out_ref):
    x = x_ref[...]                                   # (ROWS, DIM) f32

    # 1) LayerNorm over channels (affine already folded into w1/b1).
    mean = jnp.mean(x, axis=-1, keepdims=True)
    xc = x - mean
    var = jnp.mean(xc * xc, axis=-1, keepdims=True)
    xn = xc * jax.lax.rsqrt(var + LN_EPS)            # (ROWS, DIM)

    # 2+3) pointwise Conv1d(dim -> 2*inner, k=1) + GLU, as two lane-aligned
    #      matmuls (value / gate halves of w1) -- no mid-vreg lane slicing.
    w1v = wmat_ref[0:DIM, :]                         # (DIM, INNER)
    w1g = wmat_ref[DIM:2 * DIM, :]                   # (DIM, INNER)
    hv = jnp.dot(xn, w1v, preferred_element_type=jnp.float32) + wvec_ref[ROW_B1V:ROW_B1V + 1, :]
    hg = jnp.dot(xn, w1g, preferred_element_type=jnp.float32) + wvec_ref[ROW_B1G:ROW_B1G + 1, :]
    g = hv * jax.nn.sigmoid(hg)                      # (ROWS, INNER)

    # 4+5) depthwise Conv1d along T ("same" padding) with eval-mode BatchNorm
    #      folded in. A shift of s along T is a roll of s*B over the flattened
    #      row axis (XLU), with rows outside [0, T) masked to zero.
    r_idx = jax.lax.broadcasted_iota(jnp.int32, (ROWS, 1), 0)
    acc = g * wvec_ref[PAD_L:PAD_L + 1, :]           # center tap (shift 0)
    for j in range(KERNEL_SIZE):                     # static, trace-time unrolled
        s = j - PAD_L                                # tap shift along T
        if s == 0:
            continue
        rolled = pltpu.roll(g, shift=(-s * B) % ROWS, axis=0)   # rolled[r] = g[r + s*B]
        # valid rows: 0 <= t + s < T  <=>  -s*B <= r < (T - s)*B
        valid = ((r_idx >= -s * B) & (r_idx < (T - s) * B)).astype(jnp.float32)
        acc = acc + (rolled * valid) * wvec_ref[j:j + 1, :]
    acc = acc + wvec_ref[ROW_DWB:ROW_DWB + 1, :]     # folded dw bias + BN shift

    # 6) Swish
    y = acc * jax.nn.sigmoid(acc)                    # (ROWS, INNER)

    # 7) pointwise Conv1d(inner -> dim, k=1)
    w2 = wmat_ref[2 * DIM:2 * DIM + INNER, :][:, :DIM]    # (INNER, DIM)
    b2 = wvec_ref[ROW_B2:ROW_B2 + 1, :][:, :DIM]          # (1, DIM)
    o = jnp.dot(y, w2, preferred_element_type=jnp.float32) + b2
    out_ref[...] = o.astype(out_ref.dtype)
    # 8) Dropout: identity in eval mode (no-op).


def pack_params(p):
    """One-time host-side parameter folding/packing (no per-call cost)."""
    ln_g = p["ln_g"].reshape(DIM)
    ln_b = p["ln_b"].reshape(DIM)
    w1 = p["w1"]                                     # (DIM, 2*INNER)
    b1 = p["b1"].reshape(2 * INNER)

    # Fold LayerNorm affine into pointwise conv #1: (xn*g+b)@W = xn@(g[:,None]*W) + b@W.
    w1f = ln_g[:, None] * w1
    b1f = b1 + ln_b @ w1

    # Fold eval-mode BatchNorm into the depthwise conv.
    s = p["bn_g"].reshape(INNER) * jax.lax.rsqrt(p["bn_var"].reshape(INNER) + BN_EPS)
    dw_w = p["dw_w"] * s[None, :]                    # (K, INNER)
    dw_b = (p["dw_b"].reshape(INNER) - p["bn_mean"].reshape(INNER)) * s + p["bn_b"].reshape(INNER)

    w2 = p["w2"]                                     # (INNER, DIM)
    b2 = p["b2"].reshape(DIM)

    # Matmul weights: rows [0:DIM]=w1 value half, [DIM:2*DIM]=w1 gate half,
    # [2*DIM:2*DIM+INNER]=w2 (zero-padded to INNER lanes).
    w2_pad = jnp.zeros((INNER, INNER), jnp.float32).at[:, :DIM].set(w2)
    wmat = jnp.concatenate([w1f[:, :INNER], w1f[:, INNER:], w2_pad], axis=0)   # (128, 64)

    # Per-channel vectors packed into a single small array.  (K+4, INNER) = (11, 64)
    b2_pad = jnp.zeros((INNER,), jnp.float32).at[:DIM].set(b2)
    wvec = jnp.concatenate(
        [dw_w, dw_b[None, :], b1f[None, :INNER], b1f[None, INNER:], b2_pad[None, :]], axis=0)
    return wmat.astype(jnp.float32), wvec.astype(jnp.float32)


def conformer_conv_module(x_tbc, wmat, wvec):
    """x_tbc: (T, B, C) float32 -- same convention as the PyTorch module."""
    # Row-major (T, B, C) -> (T*B, C) is a free view; no transposes needed.
    x2d = x_tbc.reshape(ROWS, DIM)

    flops = (2 * ROWS * DIM * (2 * INNER)       # pointwise conv #1 (both halves)
             + 2 * ROWS * INNER * DIM           # pointwise conv #2
             + 2 * ROWS * INNER * KERNEL_SIZE)  # depthwise taps
    transcendentals = 2 * ROWS * INNER + ROWS   # two sigmoids + LN rsqrt
    bytes_accessed = 4 * (x2d.size + wmat.size + wvec.size + ROWS * DIM)

    # NOTE: at realistic sizes, add a grid over the token (T*B) axis with
    # dimension_semantics=("parallel",) and a K-1 halo for the depthwise conv;
    # at these toy shapes a single block is optimal (whole problem ~45 KB).
    out2d = pl.pallas_call(
        conformer_conv_kernel,
        out_shape=jax.ShapeDtypeStruct((ROWS, DIM), jnp.float32),
        in_specs=[pl.BlockSpec(memory_space=pltpu.MemorySpace.VMEM)] * 3,
        out_specs=pl.BlockSpec(memory_space=pltpu.MemorySpace.VMEM),
        cost_estimate=pl.CostEstimate(flops=flops,
                                      transcendentals=transcendentals,
                                      bytes_accessed=bytes_accessed),
    )(x2d, wmat, wvec)
    return out2d.reshape(T, B, DIM)


def init_params(key):
    ks = jax.random.split(key, 12)
    scale = 0.25
    return {
        # LayerNorm affine
        "ln_g": 1.0 + scale * jax.random.normal(ks[0], (1, DIM), jnp.float32),
        "ln_b": scale * jax.random.normal(ks[1], (1, DIM), jnp.float32),
        # pointwise conv1 (stored transposed: (C_in, C_out) for x @ W)
        "w1": scale * jax.random.normal(ks[2], (DIM, 2 * INNER), jnp.float32),
        "b1": scale * jax.random.normal(ks[3], (1, 2 * INNER), jnp.float32),
        # depthwise conv weight (K taps, per channel) + bias
        "dw_w": scale * jax.random.normal(ks[4], (KERNEL_SIZE, INNER), jnp.float32),
        "dw_b": scale * jax.random.normal(ks[5], (1, INNER), jnp.float32),
        # BatchNorm1d (eval-mode running stats + affine)
        "bn_g": 1.0 + scale * jax.random.normal(ks[6], (1, INNER), jnp.float32),
        "bn_b": scale * jax.random.normal(ks[7], (1, INNER), jnp.float32),
        "bn_mean": scale * jax.random.normal(ks[8], (1, INNER), jnp.float32),
        "bn_var": 1.0 + 0.1 * jnp.abs(jax.random.normal(ks[9], (1, INNER), jnp.float32)),
        # pointwise conv2 (stored transposed: (INNER, DIM))
        "w2": scale * jax.random.normal(ks[10], (INNER, DIM), jnp.float32),
        "b2": scale * jax.random.normal(ks[11], (1, DIM), jnp.float32),
    }


def reference_forward(x_tbc, p):
    """Pure-JAX reference of the module (eval mode), using the UNFOLDED params."""
    hi = jax.lax.Precision.HIGHEST
    x = x_tbc
    mean = jnp.mean(x, axis=-1, keepdims=True)
    var = jnp.mean((x - mean) ** 2, axis=-1, keepdims=True)
    xn = (x - mean) * jax.lax.rsqrt(var + LN_EPS)
    xn = xn * p["ln_g"].reshape(DIM) + p["ln_b"].reshape(DIM)
    h = jnp.dot(xn, p["w1"], precision=hi) + p["b1"].reshape(2 * INNER)   # (T, B, 2*INNER)
    g = h[..., :INNER] * jax.nn.sigmoid(h[..., INNER:])
    gp = jnp.pad(g, ((PAD_L, PAD_R), (0, 0), (0, 0)))                     # pad along T
    acc = sum(gp[j:j + T] * p["dw_w"][j] for j in range(KERNEL_SIZE))
    acc = acc + p["dw_b"].reshape(INNER)
    s = p["bn_g"].reshape(INNER) * jax.lax.rsqrt(p["bn_var"].reshape(INNER) + BN_EPS)
    y = (acc - p["bn_mean"].reshape(INNER)) * s + p["bn_b"].reshape(INNER)
    y = y * jax.nn.sigmoid(y)
    return jnp.dot(y, p["w2"], precision=hi) + p["b2"].reshape(DIM)       # (T, B, DIM)


if __name__ == "__main__":
    key = jax.random.PRNGKey(0)
    k_x, k_p = jax.random.split(key)
    x = jax.random.normal(k_x, (T, B, DIM), jnp.float32)     # (T, B, C)
    params = init_params(k_p)
    wmat, wvec = pack_params(params)                         # one-time param prep

    out = conformer_conv_module(x, wmat, wvec)
    out = jax.block_until_ready(out)

    assert out.shape == (T, B, DIM), out.shape
    assert bool(jnp.all(jnp.isfinite(out)))

    ref = reference_forward(x, params)
    max_err = float(jnp.max(jnp.abs(out - ref)))
    assert bool(jnp.allclose(out, ref, rtol=3e-2, atol=3e-2)), max_err
    print("KERNEL_OK")
</pallas_src>

<mosaic_0001>
module attributes {stable_mosaic.version = 11 : i64} {
  func.func @conformer_conv_kernel(%arg0: memref<32x32xf32, #tpu.memory_space<vmem>>, %arg1: memref<128x64xf32, #tpu.memory_space<vmem>>, %arg2: memref<11x64xf32, #tpu.memory_space<vmem>>, %arg3: memref<32x32xf32, #tpu.memory_space<vmem>>) attributes {dimension_semantics = [], scalar_prefetch = 0 : i64, scratch_operands = 0 : i64, tpu.core_type = #tpu.core_type<tc>} {
    %c0 = arith.constant 0 : index
    %c0_0 = arith.constant 0 : index
    %0 = vector.load %arg0[%c0, %c0_0] : memref<32x32xf32, #tpu.memory_space<vmem>>, vector<32x32xf32>
    %cst = arith.constant dense<0.000000e+00> : vector<32xf32>
    %1 = vector.multi_reduction <add>, %0, %cst [1] : vector<32x32xf32> to vector<32xf32>
    %2 = vector.shape_cast %1 : vector<32xf32> to vector<32x1xf32>
    %cst_1 = arith.constant 3.200000e+01 : f32
    %3 = vector.broadcast %cst_1 : f32 to vector<32x1xf32>
    %4 = arith.divf %2, %3 : vector<32x1xf32>
    %5 = vector.broadcast %4 : vector<32x1xf32> to vector<32x32xf32>
    %6 = arith.subf %0, %5 : vector<32x32xf32>
    %7 = arith.mulf %6, %6 : vector<32x32xf32>
    %cst_2 = arith.constant dense<0.000000e+00> : vector<32xf32>
    %8 = vector.multi_reduction <add>, %7, %cst_2 [1] : vector<32x32xf32> to vector<32xf32>
    %9 = vector.shape_cast %8 : vector<32xf32> to vector<32x1xf32>
    %cst_3 = arith.constant 3.200000e+01 : f32
    %10 = vector.broadcast %cst_3 : f32 to vector<32x1xf32>
    %11 = arith.divf %9, %10 : vector<32x1xf32>
    %cst_4 = arith.constant 9.99999974E-6 : f32
    %12 = vector.broadcast %cst_4 : f32 to vector<32x1xf32>
    %13 = arith.addf %11, %12 : vector<32x1xf32>
    %14 = math.rsqrt %13 : vector<32x1xf32>
    %15 = vector.broadcast %14 : vector<32x1xf32> to vector<32x32xf32>
    %16 = arith.mulf %6, %15 : vector<32x32xf32>
    %c0_5 = arith.constant 0 : index
    %c0_6 = arith.constant 0 : index
    %17 = vector.load %arg1[%c0_5, %c0_6] : memref<128x64xf32, #tpu.memory_space<vmem>>, vector<32x64xf32>
    %c32 = arith.constant 32 : index
    %c0_7 = arith.constant 0 : index
    %18 = vector.load %arg1[%c32, %c0_7] : memref<128x64xf32, #tpu.memory_space<vmem>>, vector<32x64xf32>
    %cst_8 = arith.constant dense<0.000000e+00> : vector<32x64xf32>
    %19 = tpu.matmul %16, %17, %cst_8 {dimension_numbers = #tpu.dot_dimension_numbers<[1], [0], [0], [1], [0, 0, 1, 1], [], []>} : vector<32x32xf32>, vector<32x64xf32>, vector<32x64xf32> -> vector<32x64xf32>
    %c8 = arith.constant 8 : index
    %c0_9 = arith.constant 0 : index
    %20 = vector.load %arg2[%c8, %c0_9] : memref<11x64xf32, #tpu.memory_space<vmem>>, vector<1x64xf32>
    %21 = vector.broadcast %20 : vector<1x64xf32> to vector<32x64xf32>
    %22 = arith.addf %19, %21 : vector<32x64xf32>
    %cst_10 = arith.constant dense<0.000000e+00> : vector<32x64xf32>
    %23 = tpu.matmul %16, %18, %cst_10 {dimension_numbers = #tpu.dot_dimension_numbers<[1], [0], [0], [1], [0, 0, 1, 1], [], []>} : vector<32x32xf32>, vector<32x64xf32>, vector<32x64xf32> -> vector<32x64xf32>
    %c9 = arith.constant 9 : index
    %c0_11 = arith.constant 0 : index
    %24 = vector.load %arg2[%c9, %c0_11] : memref<11x64xf32, #tpu.memory_space<vmem>>, vector<1x64xf32>
    %25 = vector.broadcast %24 : vector<1x64xf32> to vector<32x64xf32>
    %26 = arith.addf %23, %25 : vector<32x64xf32>
    %27 = arith.negf %26 : vector<32x64xf32>
    %28 = math.exp %27 : vector<32x64xf32>
    %cst_12 = arith.constant 1.000000e+00 : f32
    %29 = vector.broadcast %cst_12 : f32 to vector<32x64xf32>
    %30 = arith.addf %29, %28 : vector<32x64xf32>
    %31 = arith.divf %29, %30 : vector<32x64xf32>
    %32 = arith.mulf %22, %31 : vector<32x64xf32>
    %33 = tpu.iota {dimensions = array<i32: 0>} : vector<32x1xi32>
    %c3 = arith.constant 3 : index
    %c0_13 = arith.constant 0 : index
    %34 = vector.load %arg2[%c3, %c0_13] : memref<11x64xf32, #tpu.memory_space<vmem>>, vector<1x64xf32>
    %35 = vector.broadcast %34 : vector<1x64xf32> to vector<32x64xf32>
    %36 = arith.mulf %32, %35 : vector<32x64xf32>
    %c6_i32 = arith.constant 6 : i32
    %37 = tpu.dynamic_rotate %32 by %c6_i32 dim 0 : vector<32x64xf32>, i32 -> vector<32x64xf32>
    %c6_i32_14 = arith.constant 6 : i32
    %38 = vector.broadcast %c6_i32_14 : i32 to vector<32x1xi32>
    %39 = arith.cmpi sge, %33, %38 : vector<32x1xi32>
    %c38_i32 = arith.constant 38 : i32
    %40 = vector.broadcast %c38_i32 : i32 to vector<32x1xi32>
    %41 = arith.cmpi slt, %33, %40 : vector<32x1xi32>
    %42 = arith.andi %39, %41 : vector<32x1xi1>
    %43 = arith.extui %42 : vector<32x1xi1> to vector<32x1xi32>
    %44 = arith.sitofp %43 : vector<32x1xi32> to vector<32x1xf32>
    %45 = vector.broadcast %44 : vector<32x1xf32> to vector<32x64xf32>
    %46 = arith.mulf %37, %45 : vector<32x64xf32>
    %c0_15 = arith.constant 0 : index
    %c0_16 = arith.constant 0 : index
    %47 = vector.load %arg2[%c0_15, %c0_16] : memref<11x64xf32, #tpu.memory_space<vmem>>, vector<1x64xf32>
    %48 = vector.broadcast %47 : vector<1x64xf32> to vector<32x64xf32>
    %49 = arith.mulf %46, %48 : vector<32x64xf32>
    %50 = arith.addf %36, %49 : vector<32x64xf32>
    %c4_i32 = arith.constant 4 : i32
    %51 = tpu.dynamic_rotate %32 by %c4_i32 dim 0 : vector<32x64xf32>, i32 -> vector<32x64xf32>
    %c4_i32_17 = arith.constant 4 : i32
    %52 = vector.broadcast %c4_i32_17 : i32 to vector<32x1xi32>
    %53 = arith.cmpi sge, %33, %52 : vector<32x1xi32>
    %c36_i32 = arith.constant 36 : i32
    %54 = vector.broadcast %c36_i32 : i32 to vector<32x1xi32>
    %55 = arith.cmpi slt, %33, %54 : vector<32x1xi32>
    %56 = arith.andi %53, %55 : vector<32x1xi1>
    %57 = arith.extui %56 : vector<32x1xi1> to vector<32x1xi32>
    %58 = arith.sitofp %57 : vector<32x1xi32> to vector<32x1xf32>
    %59 = vector.broadcast %58 : vector<32x1xf32> to vector<32x64xf32>
    %60 = arith.mulf %51, %59 : vector<32x64xf32>
    %c1 = arith.constant 1 : index
    %c0_18 = arith.constant 0 : index
    %61 = vector.load %arg2[%c1, %c0_18] : memref<11x64xf32, #tpu.memory_space<vmem>>, vector<1x64xf32>
    %62 = vector.broadcast %61 : vector<1x64xf32> to vector<32x64xf32>
    %63 = arith.mulf %60, %62 : vector<32x64xf32>
    %64 = arith.addf %50, %63 : vector<32x64xf32>
    %c2_i32 = arith.constant 2 : i32
    %65 = tpu.dynamic_rotate %32 by %c2_i32 dim 0 : vector<32x64xf32>, i32 -> vector<32x64xf32>
    %c2_i32_19 = arith.constant 2 : i32
    %66 = vector.broadcast %c2_i32_19 : i32 to vector<32x1xi32>
    %67 = arith.cmpi sge, %33, %66 : vector<32x1xi32>
    %c34_i32 = arith.constant 34 : i32
    %68 = vector.broadcast %c34_i32 : i32 to vector<32x1xi32>
    %69 = arith.cmpi slt, %33, %68 : vector<32x1xi32>
    %70 = arith.andi %67, %69 : vector<32x1xi1>
    %71 = arith.extui %70 : vector<32x1xi1> to vector<32x1xi32>
    %72 = arith.sitofp %71 : vector<32x1xi32> to vector<32x1xf32>
    %73 = vector.broadcast %72 : vector<32x1xf32> to vector<32x64xf32>
    %74 = arith.mulf %65, %73 : vector<32x64xf32>
    %c2 = arith.constant 2 : index
    %c0_20 = arith.constant 0 : index
    %75 = vector.load %arg2[%c2, %c0_20] : memref<11x64xf32, #tpu.memory_space<vmem>>, vector<1x64xf32>
    %76 = vector.broadcast %75 : vector<1x64xf32> to vector<32x64xf32>
    %77 = arith.mulf %74, %76 : vector<32x64xf32>
    %78 = arith.addf %64, %77 : vector<32x64xf32>
    %c30_i32 = arith.constant 30 : i32
    %79 = tpu.dynamic_rotate %32 by %c30_i32 dim 0 : vector<32x64xf32>, i32 -> vector<32x64xf32>
    %c-2_i32 = arith.constant -2 : i32
    %80 = vector.broadcast %c-2_i32 : i32 to vector<32x1xi32>
    %81 = arith.cmpi sge, %33, %80 : vector<32x1xi32>
    %c30_i32_21 = arith.constant 30 : i32
    %82 = vector.broadcast %c30_i32_21 : i32 to vector<32x1xi32>
    %83 = arith.cmpi slt, %33, %82 : vector<32x1xi32>
    %84 = arith.andi %81, %83 : vector<32x1xi1>
    %85 = arith.extui %84 : vector<32x1xi1> to vector<32x1xi32>
    %86 = arith.sitofp %85 : vector<32x1xi32> to vector<32x1xf32>
    %87 = vector.broadcast %86 : vector<32x1xf32> to vector<32x64xf32>
    %88 = arith.mulf %79, %87 : vector<32x64xf32>
    %c4 = arith.constant 4 : index
    %c0_22 = arith.constant 0 : index
    %89 = vector.load %arg2[%c4, %c0_22] : memref<11x64xf32, #tpu.memory_space<vmem>>, vector<1x64xf32>
    %90 = vector.broadcast %89 : vector<1x64xf32> to vector<32x64xf32>
    %91 = arith.mulf %88, %90 : vector<32x64xf32>
    %92 = arith.addf %78, %91 : vector<32x64xf32>
    %c28_i32 = arith.constant 28 : i32
    %93 = tpu.dynamic_rotate %32 by %c28_i32 dim 0 : vector<32x64xf32>, i32 -> vector<32x64xf32>
    %c-4_i32 = arith.constant -4 : i32
    %94 = vector.broadcast %c-4_i32 : i32 to vector<32x1xi32>
    %95 = arith.cmpi sge, %33, %94 : vector<32x1xi32>
    %c28_i32_23 = arith.constant 28 : i32
    %96 = vector.broadcast %c28_i32_23 : i32 to vector<32x1xi32>
    %97 = arith.cmpi slt, %33, %96 : vector<32x1xi32>
    %98 = arith.andi %95, %97 : vector<32x1xi1>
    %99 = arith.extui %98 : vector<32x1xi1> to vector<32x1xi32>
    %100 = arith.sitofp %99 : vector<32x1xi32> to vector<32x1xf32>
    %101 = vector.broadcast %100 : vector<32x1xf32> to vector<32x64xf32>
    %102 = arith.mulf %93, %101 : vector<32x64xf32>
    %c5 = arith.constant 5 : index
    %c0_24 = arith.constant 0 : index
    %103 = vector.load %arg2[%c5, %c0_24] : memref<11x64xf32, #tpu.memory_space<vmem>>, vector<1x64xf32>
    %104 = vector.broadcast %103 : vector<1x64xf32> to vector<32x64xf32>
    %105 = arith.mulf %102, %104 : vector<32x64xf32>
    %106 = arith.addf %92, %105 : vector<32x64xf32>
    %c26_i32 = arith.constant 26 : i32
    %107 = tpu.dynamic_rotate %32 by %c26_i32 dim 0 : vector<32x64xf32>, i32 -> vector<32x64xf32>
    %c-6_i32 = arith.constant -6 : i32
    %108 = vector.broadcast %c-6_i32 : i32 to vector<32x1xi32>
    %109 = arith.cmpi sge, %33, %108 : vector<32x1xi32>
    %c26_i32_25 = arith.constant 26 : i32
    %110 = vector.broadcast %c26_i32_25 : i32 to vector<32x1xi32>
    %111 = arith.cmpi slt, %33, %110 : vector<32x1xi32>
    %112 = arith.andi %109, %111 : vector<32x1xi1>
    %113 = arith.extui %112 : vector<32x1xi1> to vector<32x1xi32>
    %114 = arith.sitofp %113 : vector<32x1xi32> to vector<32x1xf32>
    %115 = vector.broadcast %114 : vector<32x1xf32> to vector<32x64xf32>
    %116 = arith.mulf %107, %115 : vector<32x64xf32>
    %c6 = arith.constant 6 : index
    %c0_26 = arith.constant 0 : index
    %117 = vector.load %arg2[%c6, %c0_26] : memref<11x64xf32, #tpu.memory_space<vmem>>, vector<1x64xf32>
    %118 = vector.broadcast %117 : vector<1x64xf32> to vector<32x64xf32>
    %119 = arith.mulf %116, %118 : vector<32x64xf32>
    %120 = arith.addf %106, %119 : vector<32x64xf32>
    %c7 = arith.constant 7 : index
    %c0_27 = arith.constant 0 : index
    %121 = vector.load %arg2[%c7, %c0_27] : memref<11x64xf32, #tpu.memory_space<vmem>>, vector<1x64xf32>
    %122 = vector.broadcast %121 : vector<1x64xf32> to vector<32x64xf32>
    %123 = arith.addf %120, %122 : vector<32x64xf32>
    %124 = arith.negf %123 : vector<32x64xf32>
    %125 = math.exp %124 : vector<32x64xf32>
    %cst_28 = arith.constant 1.000000e+00 : f32
    %126 = vector.broadcast %cst_28 : f32 to vector<32x64xf32>
    %127 = arith.addf %126, %125 : vector<32x64xf32>
    %128 = arith.divf %126, %127 : vector<32x64xf32>
    %129 = arith.mulf %123, %128 : vector<32x64xf32>
    %c64 = arith.constant 64 : index
    %c0_29 = arith.constant 0 : index
    %130 = vector.load %arg1[%c64, %c0_29] : memref<128x64xf32, #tpu.memory_space<vmem>>, vector<64x64xf32>
    %131 = vector.extract_strided_slice %130 {offsets = [0, 0], sizes = [64, 32], strides = [1, 1]} : vector<64x64xf32> to vector<64x32xf32>
    %c10 = arith.constant 10 : index
    %c0_30 = arith.constant 0 : index
    %132 = vector.load %arg2[%c10, %c0_30] : memref<11x64xf32, #tpu.memory_space<vmem>>, vector<1x64xf32>
    %133 = vector.extract_strided_slice %132 {offsets = [0, 0], sizes = [1, 32], strides = [1, 1]} : vector<1x64xf32> to vector<1x32xf32>
    %cst_31 = arith.constant dense<0.000000e+00> : vector<32x32xf32>
    %134 = tpu.matmul %129, %131, %cst_31 {dimension_numbers = #tpu.dot_dimension_numbers<[1], [0], [0], [1], [0, 0, 1, 1], [], []>} : vector<32x64xf32>, vector<64x32xf32>, vector<32x32xf32> -> vector<32x32xf32>
    %135 = vector.broadcast %133 : vector<1x32xf32> to vector<32x32xf32>
    %136 = arith.addf %134, %135 : vector<32x32xf32>
    %c0_32 = arith.constant 0 : index
    %c0_33 = arith.constant 0 : index
    %137 = vector.load %arg3[%c0_32, %c0_33] : memref<32x32xf32, #tpu.memory_space<vmem>>, vector<32x32xf32>
    tpu.vector_store %arg3[%c0_32, %c0_33], %136 {strides = array<i32>} : memref<32x32xf32, #tpu.memory_space<vmem>>, vector<32x32xf32>,
    return
  }
}

</mosaic_0001>

<bundles_post_ra>
// kernel: tpu_custom_call.1
= control target key start
LH: loop header
LB: loop body
LE: loop exit
PB: predicated region body
PF: predicated region fallthrough
CT: control target
= control target key end

     0   :  { %vm19_vm0 = vcmask 261120   ;;  %s1116_s0 = inlined_call_operand.vmem [shape: f32[32,32], index: 0, kind: input, shape index: {}]   ;;  %s1117_s1 = inlined_call_operand.vmem [shape: f32[128,64], index: 1, kind: input, shape index: {}]   ;;  %s1118_s2 = inlined_call_operand.vmem [shape: f32[11,64], index: 2, kind: input, shape index: {}]   ;;  %s1119_s3 = inlined_call_operand.hbm [shape: f32[32,32], index: 3, kind: output, shape index: {}]  }
   0x1   :  { %v15_v0 = vld [vmem:[%s1116_s0] sm:$0xff]  ;;  %v17_v1 = vld [vmem:[%s1116_s0 + $0x10] sm:$0xff]  ;;  %v16_v2 = vld [vmem:[%s1116_s0 + $0x8] sm:$0xff] }
   0x2   :  { %v20_v3 = vsel %vm19_vm0, %v15_v0, 0.0  ;;  %v26_v4 = vsel %vm19_vm0, %v17_v1, 0.0  ;;  %v18_v5 = vld [vmem:[%s1116_s0 + $0x18] sm:$0xff] }
   0x3   :  { %8 = vsyncpa [#allocation3], 0  ;;  %21 = vadd.xlane.f32.xlu0 %v20_v3  ;;  %27 = vadd.xlane.f32.xlu1 %v26_v4  ;;  %v23_v6 = vsel %vm19_vm0, %v16_v2, 0.0  ;;  %v29_v7 = vsel %vm19_vm0, %v18_v5, 0.0  ;;  %v76_v28 = vld [vmem:[%s1117_s1 + $0x18] sm:$0xff]  ;;  %v75_v29 = vld [vmem:[%s1117_s1 + $0x10] sm:$0xff] }
   0x4   :  { %797 = vmatprep.subr.mxu1 %v76_v28  ;;  %v74_v30 = vld [vmem:[%s1117_s1 + $0x8] sm:$0xff]  ;;  %v73_v31 = vld [vmem:[%s1117_s1] sm:$0xff]  ;;  %v80_v32 = vld [vmem:[%s1117_s1 + $0x38] sm:$0xff]  ;;  %vm614_vm10 = vcmask 523264   ;;  %s914_s17 = smov [#allocation2]  }
   0x5   :  { %798 = vmatpush3.msra.mxu1 %v76_v28  ;;  %v79_v51 = vld [vmem:[%s1117_s1 + $0x30] sm:$0xff]  ;;  %v78_v53 = vld [vmem:[%s1117_s1 + $0x28] sm:$0xff]  ;;  %v77_v55 = vld [vmem:[%s1117_s1 + $0x20] sm:$0xff]  ;;  %s721_s18 = sshll.u32 %s914_s17, 4  ;;  %s722_s18 = int_to_ptr.vmem [resolvable:$true] %s721_s18 }
   0x6   :  { %799 = vmatprep.subr.mxu1 %v75_v29  ;;  %v608_v56 = vld [vmem:[%s1117_s1 + $0x78] sm:$0xff]  ;;  %v607_v57 = vld [vmem:[%s1117_s1 + $0x70] sm:$0xff]  ;;  %v606_v58 = vld [vmem:[%s1117_s1 + $0x68] sm:$0xff]  ;;  %p896_p1 = scmp.lt.s32.totalorder %s722_s18, %s722_s18 }
   0x7   :  { %24 = vadd.xlane.f32.xlu0 %v23_v6  ;;  %30 = vadd.xlane.f32.xlu1 %v29_v7  ;;  %v605_v59 = vld [vmem:[%s1117_s1 + $0x60] sm:$0xff]  ;;  %v604_v60 = vld [vmem:[%s1117_s1 + $0x58] sm:$0xff]  ;;  %v603_v61 = vld [vmem:[%s1117_s1 + $0x50] sm:$0xff] }
   0x8   :  { %800 = vmatpush3.msra.mxu1 %v75_v29  ;;  %825 = vmatprep.subr.mxu0 %v608_v56  ;;  %v602_v62 = vld [vmem:[%s1117_s1 + $0x48] sm:$0xff]  ;;  %v601_v63 = vld [vmem:[%s1117_s1 + $0x40] sm:$0xff] }
   0x9   :  { %801 = vmatprep.subr.mxu1 %v74_v30  ;;  %826 = vmatpush3.msra.mxu0 %v608_v56  ;;  %v737_v4 = vld [vmem:[%s1118_s2 + $0x9] ss:$0 sm:$0xff] }
   0xa   :  { %802 = vmatpush3.msra.mxu1 %v74_v30  ;;  %827 = vmatprep.subr.mxu0 %v607_v57 }
   0xb   :  { %803 = vmatprep.subr.mxu1 %v73_v31  ;;  %828 = vmatpush3.msra.mxu0 %v607_v57  ;;  %v750_v57 = vld [vmem:[%s1118_s2 + $0x1] ss:$0 sm:$0xff] }
   0xc   :  { %804 = vmatpush3.msra.mxu1 %v73_v31  ;;  %829 = vmatprep.subr.mxu0 %v606_v58 }
   0xd   :  { %811 = vmatprep.subr.mxu1 %v80_v32  ;;  %830 = vmatpush3.msra.mxu0 %v606_v58 }
   0xe   :  { %831 = vmatprep.subr.mxu0 %v605_v59 }
   0xf   :  { %832 = vmatpush3.msra.mxu0 %v605_v59 }
  0x10   :  { %833 = vmatprep.subr.mxu0 %v604_v60 }
  0x11   :  { %834 = vmatpush3.msra.mxu0 %v604_v60 }
  0x12   :  { %835 = vmatprep.subr.mxu0 %v603_v61 }
  0x13   :  { %836 = vmatpush3.msra.mxu0 %v603_v61 }
  0x14   :  { %837 = vmatprep.subr.mxu0 %v602_v62 }
  0x15   :  { %838 = vmatpush3.msra.mxu0 %v602_v62 }
  0x16   :  { %839 = vmatprep.subr.mxu0 %v601_v63 }
  0x17   :  { %840 = vmatpush3.msra.mxu0 %v601_v63 }
  0x8c   :  { %v22_v8 = vpop.xlane.xlu0 %21  ;;  %v28_v9 = vpop.xlane.xlu1 %27 }
  0x8d   :  { %v33_v10 = vmul.f32 0.03125, %v22_v8  ;;  %v35_v11 = vmul.f32 0.03125, %v28_v9 }
  0x8f   :  { %v37_v12 = vsub.f32 %v15_v0, %v33_v10  ;;  %v39_v13 = vsub.f32 %v17_v1, %v35_v11 }
  0x90   :  { %v25_v14 = vpop.xlane.xlu0 %24  ;;  %v31_v15 = vpop.xlane.xlu1 %30 }
  0x91   :  { %v34_v16 = vmul.f32 0.03125, %v25_v14  ;;  %v36_v17 = vmul.f32 0.03125, %v31_v15  ;;  %v41_v18 = vmul.f32 %v37_v12, %v37_v12  ;;  %v43_v19 = vmul.f32 %v39_v13, %v39_v13 }
  0x93   :  { %v38_v20 = vsub.f32 %v16_v2, %v34_v16  ;;  %v40_v21 = vsub.f32 %v18_v5, %v36_v17  ;;  %v45_v22 = vsel %vm19_vm0, %v41_v18, 0.0  ;;  %v51_v23 = vsel %vm19_vm0, %v43_v19, 0.0 }
  0x94   :  { %46 = vadd.xlane.f32.xlu0 %v45_v22 }
  0x95   :  { %v42_v24 = vmul.f32 %v38_v20, %v38_v20  ;;  %v44_v25 = vmul.f32 %v40_v21, %v40_v21 }
  0x97   :  { %v48_v26 = vsel %vm19_vm0, %v42_v24, 0.0  ;;  %v54_v27 = vsel %vm19_vm0, %v44_v25, 0.0 }
  0x98   :  { %52 = vadd.xlane.f32.xlu0 %v51_v23  ;;  %49 = vadd.xlane.f32.xlu1 %v48_v26  ;;  %v301_v23 = vlaneseq }
  0x9a   :  { %v1016_v26 = vshrl.u32 %v301_v23, 7 }
  0x9c   :  { %55 = vadd.xlane.f32.xlu1 %v54_v27  ;;  %v732_v27 = vld [vmem:[%s1118_s2 + $0x8] ss:$0 sm:$0xff]  ;;  %v1022_v28 = vadd.s32 24, %v1016_v26  ;;  %vm324_vm1 = vcmp.ge.s32.totalorder %v1016_v26, 6  ;;  %vm370_vm2 = vcmp.ge.s32.totalorder %v1016_v26, 4  ;;  %vm416_vm3 = vcmp.ge.s32.totalorder %v1016_v26, 2 }
  0x9d   :  { %vm319_vm5 = vcmp.lt.s32.totalorder %v1016_v26, 6  ;;  %vm365_vm6 = vcmp.lt.s32.totalorder %v1016_v26, 4  ;;  %vm411_vm7 = vcmp.lt.s32.totalorder %v1016_v26, 2 }
  0x9e   :  { %vm460_vm4 = vcmp.lt.s32.totalorder %v1022_v28, 30  ;;  %vm497_vm8 = vcmp.lt.s32.totalorder %v1022_v28, 28  ;;  %vm534_vm9 = vcmp.lt.s32.totalorder %v1022_v28, 26 }
 0x11d   :  { %v47_v33 = vpop.xlane.xlu0 %46 }
 0x11e   :  { %v57_v34 = vmul.f32 0.03125, %v47_v33 }
 0x120   :  { %v61_v35 = vadd.f32 1e-05, %v57_v34 }
 0x121   :  { %v50_v36 = vpop.xlane.xlu1 %49  ;;  %v53_v37 = vpop.xlane.xlu0 %52 }
 0x122   :  { %851 = vrsqrt.f32 %v61_v35  ;;  %v58_v38 = vmul.f32 0.03125, %v50_v36  ;;  %v59_v39 = vmul.f32 0.03125, %v53_v37  ;;  %v913_v36 = vmov 0.0  }
 0x123   :  { %v747_v37 = vsel %vm324_vm1, 1.0, %v913_v36 }
 0x124   :  { %v62_v40 = vadd.f32 1e-05, %v58_v38  ;;  %v63_v41 = vadd.f32 1e-05, %v59_v39  ;;  %v749_v38 = vsel %vm370_vm2, 1.0, %v913_v36 }
 0x125   :  { %v56_v42 = vpop.xlane.xlu1 %55 }
 0x126   :  { %853 = vrsqrt.f32 %v62_v40  ;;  %v60_v43 = vmul.f32 0.03125, %v56_v42  ;;  %v751_v42 = vsel %vm416_vm3, 1.0, %v913_v36 }
 0x127   :  { %855 = vrsqrt.f32 %v63_v41  ;;  %v1036_v41 = vld [vmem:[%s1118_s2 + $0x3] ss:$0 sm:$0xff] }
 0x128   :  { %v64_v44 = vadd.f32 1e-05, %v60_v43  ;;  %v1038_v43 = vsel %vm460_vm4, 1.0, %v913_v36 }
 0x12a   :  { %857 = vrsqrt.f32 %v64_v44 }
 0x12f   :  { %v852_v45 = vpop.eup %851 }
 0x130   :  { %v69_v46 = vmul.f32 %v852_v45, %v37_v12 }
 0x132   :  { %805 = vmatprep.mubr.msk.f32.mxu1 %vm19_vm0, %v69_v46 }
 0x133   :  { %v854_v47 = vpop.eup %853 }
 0x134   :  { %v856_v48 = vpop.eup %855  ;;  %v70_v49 = vmul.f32 %v854_v47, %v38_v20  ;;  %v748_v47 = vld [vmem:[%s1118_s2] ss:$0 sm:$0xff] }
 0x135   :  { %v71_v50 = vmul.f32 %v856_v48, %v39_v13 }
 0x136   :  { %806 = vmatmul.mubr.msk.f32.vlgmr.msra.gmra.mxu1 %vm19_vm0, %v70_v49 }
 0x137   :  { %v858_v52 = vpop.eup %857  ;;  %812 = vmatpush3.msra.mxu1 %v80_v32  ;;  %808 = vmatprep.mubr.msk.f32.mxu1 %vm19_vm0, %v71_v50 }
 0x138   :  { %813 = vmatprep.subr.mxu1 %v79_v51  ;;  %v72_v54 = vmul.f32 %v858_v52, %v40_v21 }
 0x139   :  { %814 = vmatpush3.msra.mxu1 %v79_v51 }
 0x13a   :  { %815 = vmatprep.subr.mxu1 %v78_v53  ;;  %809 = vmatmul.mubr.msk.f32.gmra.mxu1 %vm19_vm0, %v72_v54 }
 0x13b   :  { %816 = vmatpush3.msra.mxu1 %v78_v53  ;;  %819 = vmatprep.mubr.msk.f32.mxu1 %vm19_vm0, %v69_v46 }
 0x13c   :  { %817 = vmatprep.subr.mxu1 %v77_v55 }
 0x13d   :  { %818 = vmatpush3.msra.mxu1 %v77_v55 }
 0x13e   :  { %820 = vmatmul.mubr.msk.f32.vlgmr.msra.gmra.mxu1 %vm19_vm0, %v70_v49 }
 0x13f   :  { %822 = vmatprep.mubr.msk.f32.mxu1 %vm19_vm0, %v71_v50 }
 0x142   :  { %823 = vmatmul.mubr.msk.f32.gmra.mxu1 %vm19_vm0, %v72_v54 }
 0x1f6   :  { %v807_v0 = vpop.f32.mrf.mxu1 }
 0x1f7   :  { %v170_v29 = vadd.f32 %v807_v0, %v732_v27 }
 0x1f8   :  { %v164_v1 = vpop.f32.mrf.mxu1 }
 0x1f9   :  { %v165_v31 = vadd.f32 %v732_v27, %v164_v1 }
 0x1fa   :  { %v810_v2 = vpop.f32.mrf.mxu1 }
 0x1fb   :  { %v180_v34 = vadd.f32 %v810_v2, %v732_v27  ;;  %v752_v2 = vld [vmem:[%s1118_s2 + $0x2] ss:$0 sm:$0xff] }
 0x1fc   :  { %v174_v3 = vpop.f32.mrf.mxu1 }
 0x1fd   :  { %v175_v40 = vadd.f32 %v732_v27, %v174_v3 }
 0x1fe   :  { %v821_v5 = vpop.f32.mrf.mxu1 }
 0x1ff   :  { %v260_v6 = vadd.f32 %v821_v5, %v737_v4 }
 0x200   :  { %v254_v7 = vpop.f32.mrf.mxu1 }
 0x201   :  { %v743_v8 = vmul.f32 -1.442695, %v260_v6  ;;  %v255_v9 = vadd.f32 %v737_v4, %v254_v7 }
 0x202   :  { %v824_v10 = vpop.f32.mrf.mxu1 }
 0x203   :  { %859 = vpow2.f32 %v743_v8  ;;  %v742_v11 = vmul.f32 -1.442695, %v255_v9  ;;  %v270_v12 = vadd.f32 %v824_v10, %v737_v4  ;;  %v755_v10 = vsel %vm497_vm8, 1.0, %v913_v36 }
 0x204   :  { %v264_v13 = vpop.f32.mrf.mxu1 }
 0x205   :  { %861 = vpow2.f32 %v742_v11  ;;  %v745_v14 = vmul.f32 -1.442695, %v270_v12  ;;  %v265_v15 = vadd.f32 %v737_v4, %v264_v13 }
 0x207   :  { %863 = vpow2.f32 %v745_v14  ;;  %v744_v16 = vmul.f32 -1.442695, %v265_v15 }
 0x209   :  { %865 = vpow2.f32 %v744_v16 }
 0x210   :  { %v860_v17 = vpop.eup %859 }
 0x211   :  { %v286_v18 = vadd.f32 1.0, %v860_v17 }
 0x212   :  { %v862_v19 = vpop.eup %861 }
 0x213   :  { %867 = vrcp.f32 %v286_v18  ;;  %v285_v20 = vadd.f32 1.0, %v862_v19  ;;  %v754_v18 = vld [vmem:[%s1118_s2 + $0x4] ss:$0 sm:$0xff]  ;;  %v757_v19 = vsel %vm534_vm9, 1.0, %v913_v36 }
 0x214   :  { %v864_v21 = vpop.eup %863 }
 0x215   :  { %869 = vrcp.f32 %v285_v20  ;;  %v288_v22 = vadd.f32 1.0, %v864_v21 }
 0x216   :  { %v866_v24 = vpop.eup %865 }
 0x217   :  { %871 = vrcp.f32 %v288_v22  ;;  %v287_v25 = vadd.f32 1.0, %v866_v24 }
 0x219   :  { %873 = vrcp.f32 %v287_v25 }
 0x220   :  { %v868_v30 = vpop.eup %867 }
 0x221   :  { %v1026_v32 = vmul.f32 %v868_v30, %v170_v29 }
 0x222   :  { %v870_v33 = vpop.eup %869 }
 0x223   :  { %v297_v35 = vmul.f32 %v870_v33, %v165_v31  ;;  %v316_v46 = vrot.slane %v1026_v32, 2  ;;  %v362_v50 = vrot.slane %v1026_v32, 4  ;;  %v408_v52 = vrot.slane %v1026_v32, 6 }
 0x224   :  { %v872_v39 = vpop.eup %871  ;;  %v312_v58 = vmul.f32 %v1036_v41, %v1026_v32  ;;  %v756_v32 = vld [vmem:[%s1118_s2 + $0x5] ss:$0 sm:$0xff] }
 0x225   :  { %v1041_v44 = vmul.f32 %v872_v39, %v180_v34  ;;  %v315_v45 = vrot.slane %v297_v35, 2  ;;  %v361_v48 = vrot.slane %v297_v35, 4  ;;  %v407_v51 = vrot.slane %v297_v35, 6 }
 0x226   :  { %v874_v49 = vpop.eup %873  ;;  %v311_v7 = vmul.f32 %v1036_v41, %v297_v35 }
 0x227   :  { %v299_v53 = vmul.f32 %v874_v49, %v175_v40  ;;  %v318_v54 = vrot.slane %v1041_v44, 2  ;;  %v322_v55 = vsel %vm319_vm5, %v315_v45, %v316_v46  ;;  %v364_v56 = vrot.slane %v1041_v44, 4  ;;  %v758_v40 = vld [vmem:[%s1118_s2 + $0x6] ss:$0 sm:$0xff] }
 0x228   :  { %v354_v59 = vmul.f32 %v748_v47, %v322_v55  ;;  %v368_v60 = vsel %vm365_vm6, %v361_v48, %v362_v50  ;;  %v410_v61 = vrot.slane %v1041_v44, 6  ;;  %v414_v1 = vsel %vm411_vm7, %v407_v51, %v408_v52 }
 0x229   :  { %v317_v62 = vrot.slane %v299_v53, 2  ;;  %v323_v63 = vsel %vm319_vm5, %v318_v54, %v315_v45  ;;  %v369_v0 = vsel %vm365_vm6, %v364_v56, %v361_v48  ;;  %v400_v6 = vmul.f32 %v750_v57, %v368_v60 }
 0x22a   :  { %v344_v3 = vmul.f32 %v747_v37, %v323_v63  ;;  %v358_v4 = vadd.f32 %v354_v59, %v312_v58  ;;  %v390_v5 = vmul.f32 %v749_v38, %v369_v0  ;;  %v415_v9 = vsel %vm411_vm7, %v410_v61, %v407_v51 }
 0x22b   :  { %v321_v8 = vsel %vm319_vm5, %v316_v46, %v317_v62  ;;  %v446_v14 = vmul.f32 %v752_v2, %v414_v1  ;;  %v313_v15 = vmul.f32 %v1036_v41, %v299_v53  ;;  %v436_v17 = vmul.f32 %v751_v42, %v415_v9 }
 0x22c   :  { %v353_v11 = vmul.f32 %v748_v47, %v344_v3  ;;  %v355_v12 = vmul.f32 %v748_v47, %v321_v8  ;;  %v404_v13 = vadd.f32 %v400_v6, %v358_v4  ;;  %v399_v16 = vmul.f32 %v750_v57, %v390_v5 }
 0x22d   :  { %v483_v22 = vmul.f32 %v754_v18, %v321_v8  ;;  %v363_v23 = vrot.slane %v299_v53, 4  ;;  %v445_v25 = vmul.f32 %v752_v2, %v436_v17  ;;  %v409_v27 = vrot.slane %v299_v53, 6 }
 0x22e   :  { %v357_v20 = vadd.f32 %v353_v11, %v311_v7  ;;  %v450_v21 = vadd.f32 %v446_v14, %v404_v13  ;;  %v359_v24 = vadd.f32 %v355_v12, %v313_v15  ;;  %v320_v29 = vsel %vm319_vm5, %v317_v62, %v318_v54 }
 0x22f   :  { %v367_v28 = vsel %vm365_vm6, %v362_v50, %v363_v23  ;;  %v356_v33 = vmul.f32 %v748_v47, %v320_v29  ;;  %v413_v35 = vsel %vm411_vm7, %v408_v52, %v409_v27  ;;  %v366_v37 = vsel %vm365_vm6, %v363_v23, %v364_v56  ;;  %v759_v52 = vld [vmem:[%s1118_s2 + $0x7] ss:$0 sm:$0xff] }
 0x230   :  { %v403_v30 = vadd.f32 %v399_v16, %v357_v20  ;;  %v487_v31 = vadd.f32 %v483_v22, %v450_v21  ;;  %v401_v34 = vmul.f32 %v750_v57, %v367_v28  ;;  %v520_v36 = vmul.f32 %v756_v32, %v367_v28 }
 0x231   :  { %v482_v39 = vmul.f32 %v754_v18, %v322_v55  ;;  %v447_v42 = vmul.f32 %v752_v2, %v413_v35  ;;  %v314_v45 = vmul.f32 %v1036_v41, %v1041_v44  ;;  %v557_v47 = vmul.f32 %v758_v40, %v413_v35  ;;  %v764_v35 = vld [vmem:[%s1118_s2 + $0xa] ss:$0 sm:$0xff]  ;;  %s891_s2 = scalar_lea.vmem %s722_s18, 512 }
 0x232   :  { %v449_v38 = vadd.f32 %v445_v25, %v403_v30  ;;  %v524_v46 = vadd.f32 %v520_v36, %v487_v31  ;;  %v405_v48 = vadd.f32 %v401_v34, %v359_v24  ;;  %v412_v49 = vsel %vm411_vm7, %v409_v27, %v410_v61  ;;  %p892_p0 = scmp.ne.s32.totalorder %s722_s18, %s891_s2  ;;  %p897_p2 = scmp.lt.s32.totalorder %s891_s2, %s891_s2 }
 0x233   :  { %v519_v51 = vmul.f32 %v756_v32, %v368_v60  ;;  %v402_v53 = vmul.f32 %v750_v57, %v366_v37  ;;  %v484_v54 = vmul.f32 %v754_v18, %v320_v29  ;;  %v360_v58 = vadd.f32 %v356_v33, %v314_v45 }
 0x234   :  { %v486_v50 = vadd.f32 %v482_v39, %v449_v38  ;;  %v561_v55 = vadd.f32 %v557_v47, %v524_v46  ;;  %v451_v56 = vadd.f32 %v447_v42, %v405_v48  ;;  %v476_v59 = vmul.f32 %v1038_v43, %v323_v63  ;;  %p898_p3 = por %p897_p2, %p896_p1 }
 0x235   :  { %v556_v44 = vmul.f32 %v758_v40, %v414_v1  ;;  %v448_v62 = vmul.f32 %v752_v2, %v412_v49  ;;  %v521_v3 = vmul.f32 %v756_v32, %v366_v37  ;;  %v406_v61 = vadd.f32 %v402_v53, %v360_v58 }
 0x236   :  { %v523_v41 = vadd.f32 %v519_v51, %v486_v50  ;;  %v570_v4 = vadd.f32 %v759_v52, %v561_v55  ;;  %v488_v26 = vadd.f32 %v484_v54, %v451_v56  ;;  %v513_v5 = vmul.f32 %v755_v10, %v369_v0  ;;  %p899_p4 = pnand %p898_p3, %p892_p0 }
 0x237   :  { %v558_v6 = vmul.f32 %v758_v40, %v412_v49  ;;  %v550_v7 = vmul.f32 %v757_v19, %v415_v9  ;;  %v452_v57 = vadd.f32 %v448_v62, %v406_v61  ;;  %v485_v12 = vmul.f32 %v754_v18, %v476_v59 }
 0x238   :  { %v560_v60 = vadd.f32 %v556_v44, %v523_v41  ;;  %v761_v8 = vmul.f32 -1.442695, %v570_v4  ;;  %v525_v11 = vadd.f32 %v521_v3, %v488_v26  ;;  %v522_v43 = vmul.f32 %v756_v32, %v513_v5 }
 0x239   :  { %v489_v15 = vadd.f32 %v485_v12, %v452_v57  ;;  %v559_v16 = vmul.f32 %v758_v40, %v550_v7 }
 0x23a   :  { %v569_v13 = vadd.f32 %v759_v52, %v560_v60  ;;  %875 = vpow2.f32 %v761_v8  ;;  %v562_v14 = vadd.f32 %v558_v6, %v525_v11 }
 0x23b   :  { %v526_v2 = vadd.f32 %v522_v43, %v489_v15 }
 0x23c   :  { %v760_v63 = vmul.f32 -1.442695, %v569_v13  ;;  %v571_v1 = vadd.f32 %v759_v52, %v562_v14 }
 0x23d   :  { %v563_v20 = vadd.f32 %v559_v16, %v526_v2 }
 0x23e   :  { %877 = vpow2.f32 %v760_v63  ;;  %v762_v17 = vmul.f32 -1.442695, %v571_v1 }
 0x23f   :  { %v572_v0 = vadd.f32 %v759_v52, %v563_v20 }
 0x240   :  { %879 = vpow2.f32 %v762_v17 }
 0x241   :  { %v763_v10 = vmul.f32 -1.442695, %v572_v0 }
 0x243   :  { %881 = vpow2.f32 %v763_v10 }
 0x247   :  { %v876_v9 = vpop.eup %875 }
 0x248   :  { %v586_v19 = vadd.f32 1.0, %v876_v9 }
 0x24a   :  { %883 = vrcp.f32 %v586_v19 }
 0x24b   :  { %v878_v21 = vpop.eup %877 }
 0x24c   :  { %v585_v18 = vadd.f32 1.0, %v878_v21 }
 0x24d   :  { %v880_v22 = vpop.eup %879 }
 0x24e   :  { %885 = vrcp.f32 %v585_v18  ;;  %v587_v23 = vadd.f32 1.0, %v880_v22 }
 0x250   :  { %887 = vrcp.f32 %v587_v23  ;;  %v882_v24 = vpop.eup %881 }
 0x251   :  { %v588_v25 = vadd.f32 1.0, %v882_v24 }
 0x253   :  { %889 = vrcp.f32 %v588_v25 }
 0x257   :  { %v884_v27 = vpop.eup %883 }
 0x258   :  { %v598_v31 = vmul.f32 %v884_v27, %v570_v4 }
 0x25b   :  { %v886_v29 = vpop.eup %885 }
 0x25c   :  { %v597_v30 = vmul.f32 %v886_v29, %v569_v13 }
 0x25d   :  { %v888_v32 = vpop.eup %887 }
 0x25e   :  { %841 = vmatprep.mubr.msk.f32.mxu0 %vm614_vm10, %v597_v30  ;;  %v599_v28 = vmul.f32 %v888_v32, %v571_v1 }
 0x25f   :  { %842 = vmatmul.mubr.msk.f32.vlgmr.msra.gmra.mxu0 %vm614_vm10, %v598_v31 }
 0x260   :  { %844 = vmatprep.mubr.msk.f32.mxu0 %vm614_vm10, %v599_v28  ;;  %v890_v33 = vpop.eup %889 }
 0x261   :  { %v600_v34 = vmul.f32 %v890_v33, %v572_v0 }
 0x263   :  { %845 = vmatmul.mubr.msk.f32.gmra.mxu0 %vm614_vm10, %v600_v34 }
 0x31f   :  { %v843_v36 = vpop.f32.mrf.mxu0 }
 0x320   :  { %v699_v37 = vadd.f32 %v843_v36, %v764_v35 }
 0x321   :  { %v693_v38 = vpop.f32.mrf.mxu0 }
 0x322   :  { %713 = vst.msk [vmem:[#allocation2 + $0x8] sm:$0xff] %vm19_vm0, %v699_v37  ;;  %v694_v39 = vadd.f32 %v764_v35, %v693_v38 }
 0x323   :  { %v846_v40 = vpop.f32.mrf.mxu0 }
 0x324   :  { %712 = vst.msk [vmem:[#allocation2] sm:$0xff] %vm19_vm0, %v694_v39  ;;  %v709_v42 = vadd.f32 %v846_v40, %v764_v35 }
 0x325   :  { %v703_v45 = vpop.f32.mrf.mxu0 }
 0x326   :  { %715 = vst.msk [vmem:[#allocation2 + $0x18] sm:$0xff] %vm19_vm0, %v709_v42  ;;  %v704_v46 = vadd.f32 %v764_v35, %v703_v45 }
 0x328   :  { %714 = vst.msk [vmem:[#allocation2 + $0x10] sm:$0xff] %vm19_vm0, %v704_v46 }
 0x329   :  { %902 = shalt.err (!%p899_p4)
}
 0x32a   :  { %s915_s19 = smov 128   ;;  %s916_s0 = smov 8  }
 0x32b   :  { %727 = dma.vmem_to_hbm [thread:$0]  %s722_s18, 512, %s1119_s3, [#allocation3], %s915_s19, %s915_s19, %s916_s0  }
 0x32c   :  { %911 = dma.done.wait [#allocation3], 512  }
 0x32d   :  { %912 = vsyncadd [#allocation3], 4294966784 }
 0x32e   :  { %731 = vsyncpa [#allocation3], 1 }

</bundles_post_ra>
